<compile_context>
chip_gen: v7x
topology: tpu7x:2x2x1
jax: 0.10.0
libtpu: 0.0.40
codegen_flags: <defaults>
</compile_context>

<pallas_src>
import functools

import jax
import jax.numpy as jnp
from jax.experimental import pallas as pl
from jax.experimental.pallas import tpu as pltpu


def _ff_matmul_kernel(enc_ref, dec_ref, w_enc_ref, w_dec_ref, bias_ref,
                      out_ref, acc_ref):
    """One (tm, tn) output tile; K (reduction) is the last grid axis."""
    k = pl.program_id(2)

    @pl.when(k == 0)
    def _():
        acc_ref[...] = jnp.zeros_like(acc_ref)

    # Cast activations to bf16 in the kernel prologue (weights already bf16);
    # accumulate in f32 on the MXU.
    a_enc = enc_ref[...].astype(jnp.bfloat16)
    a_dec = dec_ref[...].astype(jnp.bfloat16)
    acc_ref[...] += jnp.dot(a_enc, w_enc_ref[...],
                            preferred_element_type=jnp.float32)
    acc_ref[...] += jnp.dot(a_dec, w_dec_ref[...],
                            preferred_element_type=jnp.float32)

    @pl.when(k == pl.num_programs(2) - 1)
    def _():
        y = acc_ref[...] + bias_ref[...].astype(jnp.float32)
        # ReLU fused in the epilogue.  All computed output columns correspond
        # to sequence positions < S, where dec_mask == 1 -> no re-mask needed.
        out_ref[...] = jnp.maximum(y, 0.0).astype(out_ref.dtype)


def attention_substitute_decoder_ca(query, key, value, mask, w, bias, *,
                                    max_len, num_heads,
                                    tm=None, tk=256, tn=256):
    """Forward pass of AttentionSubstituteDecoderCA with a Linear+ReLU FF stand-in.

    query/key/value: [B, S, MD]  mask: [B, 1, 1, S] bool
    w: [2*F, F] bf16, bias: [F] f32, with F = max_len * MD.
    Returns [B, NH, S, HD].
    """
    del key  # unused by the original forward pass
    B, S, MD = value.shape
    assert query.shape == (B, S, MD)
    assert mask.shape == (B, 1, 1, S)
    assert MD % num_heads == 0
    HD = MD // num_heads
    F = max_len * MD            # flat feature width after padding to MAX_LEN
    Ka = S * MD                 # "active" (non-padded) flat feature width
    assert S <= max_len
    assert w.shape == (2 * F, F)
    assert bias.shape == (F,)

    if tm is None:
        tm = B                  # small batch: full B per tile (M is underfilled anyway)
    tk = min(tk, Ka)
    tn = min(tn, Ka)
    assert B % tm == 0 and (tm % 8 == 0 or tm == B)
    assert Ka % tk == 0 and tk % 128 == 0
    assert Ka % tn == 0 and tn % 128 == 0
    assert F % tk == 0          # needed to block-address the decoder half of W

    # enc activations: value masked by the (unpadded) boolean mask, flattened.
    # dec activations: query flattened (dec_mask is all-ones over positions < S).
    # Neither the MAX_LEN-padded tensors nor the repeat_interleaved masks are
    # materialized; padded rows/columns contribute exactly zero and are skipped.
    m2 = mask.reshape(B, S).astype(value.dtype)
    enc_act = (value * m2[:, :, None]).reshape(B, Ka)
    dec_act = query.reshape(B, Ka)
    bias2 = bias.reshape(1, F)

    grid = (B // tm, Ka // tn, Ka // tk)
    dec_row_base = F // tk      # block-row offset of the decoder half of W

    in_specs = [
        pl.BlockSpec((tm, tk), lambda i, j, k: (i, k)),                  # enc_act
        pl.BlockSpec((tm, tk), lambda i, j, k: (i, k)),                  # dec_act
        pl.BlockSpec((tk, tn), lambda i, j, k: (k, j)),                  # W rows [0, Ka)
        pl.BlockSpec((tk, tn), lambda i, j, k: (dec_row_base + k, j)),   # W rows [F, F+Ka)
        pl.BlockSpec((1, tn), lambda i, j, k: (0, j)),                   # bias
    ]
    out_specs = pl.BlockSpec((tm, tn), lambda i, j, k: (i, j))           # const in K

    act_b = int(enc_act.dtype.itemsize)
    w_b = int(w.dtype.itemsize)
    bias_b = int(bias2.dtype.itemsize)
    out_b = 4  # f32 output

    # Double-buffered tile budget; cap at 48 MiB so it also fits v7x (64 MiB VMEM).
    vmem_est = (2 * 2 * tm * tk * act_b        # enc + dec activation tiles
                + 2 * 2 * tk * tn * w_b        # two weight operands
                + 2 * 1 * tn * bias_b          # bias tile
                + 2 * tm * tn * out_b          # output tile
                + tm * tn * 4)                 # f32 accumulator scratch
    vmem_limit = int(min(max(2 * vmem_est, 32 * 1024 * 1024), 48 * 1024 * 1024))

    cost = pl.CostEstimate(
        flops=2 * B * (2 * Ka) * Ka,
        transcendentals=0,
        bytes_accessed=(2 * Ka * Ka * w_b            # active weight rows/cols only
                        + 2 * B * Ka * act_b         # enc + dec activations
                        + Ka * bias_b
                        + B * Ka * out_b),
    )

    out_flat = pl.pallas_call(
        _ff_matmul_kernel,
        out_shape=jax.ShapeDtypeStruct((B, Ka), jnp.float32),
        grid_spec=pltpu.PrefetchScalarGridSpec(
            num_scalar_prefetch=0,
            grid=grid,
            in_specs=in_specs,
            out_specs=out_specs,
            scratch_shapes=[pltpu.VMEM((tm, tn), jnp.float32)],
        ),
        compiler_params=pltpu.CompilerParams(
            dimension_semantics=("parallel", "parallel", "arbitrary"),
            vmem_limit_bytes=vmem_limit,
        ),
        cost_estimate=cost,
    )(enc_act, dec_act, w, w, bias2)

    # [B, S*MD] -> [B, S, NH, HD] -> [B, NH, S, HD]   (padded tail never computed:
    # it is re-masked to zero and discarded by the original module's split).
    out = out_flat.reshape(B, S, num_heads, HD).transpose(0, 2, 1, 3)
    return out.astype(value.dtype)


def _reference(query, key, value, mask, w, bias, *, max_len, num_heads):
    """Pure-JAX mirror of the PyTorch forward (same FF stand-in), incl. padding."""
    del key
    B, S, MD = value.shape
    F = max_len * MD
    HD = MD // num_heads
    pad = max_len - S
    m2 = mask.reshape(B, S).astype(jnp.float32)
    enc = jnp.pad(value.astype(jnp.float32), ((0, 0), (0, pad), (0, 0)))
    dec = jnp.pad(query.astype(jnp.float32), ((0, 0), (0, pad), (0, 0)))
    enc_mask = jnp.repeat(jnp.pad(m2, ((0, 0), (0, pad))), MD, axis=1)
    dec_mask = jnp.repeat(
        jnp.pad(jnp.ones((B, S), jnp.float32), ((0, 0), (0, pad))), MD, axis=1)
    enc_in = enc.reshape(B, F) * enc_mask
    dec_in = dec.reshape(B, F) * dec_mask
    inputs = jnp.concatenate([enc_in, dec_in], axis=1)          # [B, 2F]
    y = jnp.dot(inputs.astype(jnp.bfloat16), w,
                preferred_element_type=jnp.float32) + bias[None, :].astype(jnp.float32)
    y = jnp.maximum(y, 0.0) * dec_mask                          # FF re-masks its output
    out = y.reshape(B, max_len, num_heads, HD).transpose(0, 2, 1, 3)
    return out[:, :, :S, :]                                     # drop (all-zero) padding


if __name__ == "__main__":
    B, S, MAX_LEN, NH, HD = 4, 8, 16, 8, 8
    MD = NH * HD                 # 64
    F = MAX_LEN * MD             # 1024

    root = jax.random.PRNGKey(0)
    kq, kk, kv, kw, kb = jax.random.split(root, 5)
    query = jax.random.normal(kq, (B, S, MD), jnp.float32)
    key_t = jax.random.normal(kk, (B, S, MD), jnp.float32)      # unused (interface only)
    value = jax.random.normal(kv, (B, S, MD), jnp.float32)
    lens = jnp.array([S, 6, S, 3], jnp.int32)
    mask = (jnp.arange(S)[None, :] < lens[:, None]).reshape(B, 1, 1, S)

    # FF stand-in parameters: Linear(2F -> F), weights in bf16, bias in f32.
    w = (jax.random.normal(kw, (2 * F, F), jnp.float32)
         / jnp.sqrt(2.0 * F)).astype(jnp.bfloat16)
    bias = 0.1 * jax.random.normal(kb, (F,), jnp.float32)

    fwd = jax.jit(functools.partial(attention_substitute_decoder_ca,
                                    max_len=MAX_LEN, num_heads=NH))
    out = fwd(query, key_t, value, mask, w, bias)
    jax.block_until_ready(out)

    assert out.shape == (B, NH, S, HD), out.shape

    ref = _reference(query, key_t, value, mask, w, bias,
                     max_len=MAX_LEN, num_heads=NH)
    err = jnp.max(jnp.abs(out.astype(jnp.float32) - ref))
    assert bool(jnp.isfinite(err)) and float(err) < 5e-3, float(err)

    print("KERNEL_OK")
</pallas_src>

<mosaic_0001>
module attributes {stable_mosaic.version = 11 : i64} {
  func.func @_ff_matmul_kernel(%arg0: i32, %arg1: i32, %arg2: i32, %arg3: memref<4x256xf32, #tpu.memory_space<vmem>>, %arg4: memref<4x256xf32, #tpu.memory_space<vmem>>, %arg5: memref<256x256xbf16, #tpu.memory_space<vmem>>, %arg6: memref<256x256xbf16, #tpu.memory_space<vmem>>, %arg7: memref<1x256xf32, #tpu.memory_space<vmem>>, %arg8: memref<4x256xf32, #tpu.memory_space<vmem>>, %arg9: memref<4x256xf32, #tpu.memory_space<vmem>>) attributes {dimension_semantics = [#tpu.dimension_semantics<parallel>, #tpu.dimension_semantics<parallel>, #tpu.dimension_semantics<arbitrary>], iteration_bounds = array<i64: 1, 2, 2>, scalar_prefetch = 0 : i64, scratch_operands = 1 : i64, tpu.core_type = #tpu.core_type<tc>, window_params = [{transform_indices = @transform_0, window_bounds = array<i64: 4, 256>}, {transform_indices = @transform_1, window_bounds = array<i64: 4, 256>}, {transform_indices = @transform_2, window_bounds = array<i64: 256, 256>}, {transform_indices = @transform_3, window_bounds = array<i64: 256, 256>}, {transform_indices = @transform_4, window_bounds = array<i64: 1, 256>}, {transform_indices = @transform_5, window_bounds = array<i64: 4, 256>}]} {
    %c0_i32 = arith.constant 0 : i32
    %0 = arith.cmpi eq, %arg2, %c0_i32 : i32
    %1 = arith.extui %0 : i1 to i32
    %c0_i32_0 = arith.constant 0 : i32
    %2 = arith.cmpi ne, %1, %c0_i32_0 : i32
    scf.if %2 {
      %cst_18 = arith.constant 0.000000e+00 : f32
      %20 = vector.broadcast %cst_18 : f32 to vector<4x256xf32>
      %c0_19 = arith.constant 0 : index
      %c0_20 = arith.constant 0 : index
      %21 = vector.load %arg9[%c0_19, %c0_20] : memref<4x256xf32, #tpu.memory_space<vmem>>, vector<4x256xf32>
      tpu.vector_store %arg9[%c0_19, %c0_20], %20 {strides = array<i32>} : memref<4x256xf32, #tpu.memory_space<vmem>>, vector<4x256xf32>,
    } else {
    }
    %c0 = arith.constant 0 : index
    %c0_1 = arith.constant 0 : index
    %3 = vector.load %arg3[%c0, %c0_1] : memref<4x256xf32, #tpu.memory_space<vmem>>, vector<4x256xf32>
    %4 = arith.truncf %3 : vector<4x256xf32> to vector<4x256xbf16>
    %c0_2 = arith.constant 0 : index
    %c0_3 = arith.constant 0 : index
    %5 = vector.load %arg4[%c0_2, %c0_3] : memref<4x256xf32, #tpu.memory_space<vmem>>, vector<4x256xf32>
    %6 = arith.truncf %5 : vector<4x256xf32> to vector<4x256xbf16>
    %c0_4 = arith.constant 0 : index
    %c0_5 = arith.constant 0 : index
    %7 = vector.load %arg9[%c0_4, %c0_5] : memref<4x256xf32, #tpu.memory_space<vmem>>, vector<4x256xf32>
    %c0_6 = arith.constant 0 : index
    %c0_7 = arith.constant 0 : index
    %8 = vector.load %arg5[%c0_6, %c0_7] : memref<256x256xbf16, #tpu.memory_space<vmem>>, vector<256x256xbf16>
    %cst = arith.constant dense<0.000000e+00> : vector<4x256xf32>
    %9 = tpu.matmul %4, %8, %cst {dimension_numbers = #tpu.dot_dimension_numbers<[1], [0], [0], [1], [0, 0, 1, 1], [], []>} : vector<4x256xbf16>, vector<256x256xbf16>, vector<4x256xf32> -> vector<4x256xf32>
    %10 = arith.addf %7, %9 : vector<4x256xf32>
    %c0_8 = arith.constant 0 : index
    %c0_9 = arith.constant 0 : index
    %11 = vector.load %arg9[%c0_8, %c0_9] : memref<4x256xf32, #tpu.memory_space<vmem>>, vector<4x256xf32>
    tpu.vector_store %arg9[%c0_8, %c0_9], %10 {strides = array<i32>} : memref<4x256xf32, #tpu.memory_space<vmem>>, vector<4x256xf32>,
    %c0_10 = arith.constant 0 : index
    %c0_11 = arith.constant 0 : index
    %12 = vector.load %arg9[%c0_10, %c0_11] : memref<4x256xf32, #tpu.memory_space<vmem>>, vector<4x256xf32>
    %c0_12 = arith.constant 0 : index
    %c0_13 = arith.constant 0 : index
    %13 = vector.load %arg6[%c0_12, %c0_13] : memref<256x256xbf16, #tpu.memory_space<vmem>>, vector<256x256xbf16>
    %cst_14 = arith.constant dense<0.000000e+00> : vector<4x256xf32>
    %14 = tpu.matmul %6, %13, %cst_14 {dimension_numbers = #tpu.dot_dimension_numbers<[1], [0], [0], [1], [0, 0, 1, 1], [], []>} : vector<4x256xbf16>, vector<256x256xbf16>, vector<4x256xf32> -> vector<4x256xf32>
    %15 = arith.addf %12, %14 : vector<4x256xf32>
    %c0_15 = arith.constant 0 : index
    %c0_16 = arith.constant 0 : index
    %16 = vector.load %arg9[%c0_15, %c0_16] : memref<4x256xf32, #tpu.memory_space<vmem>>, vector<4x256xf32>
    tpu.vector_store %arg9[%c0_15, %c0_16], %15 {strides = array<i32>} : memref<4x256xf32, #tpu.memory_space<vmem>>, vector<4x256xf32>,
    %c1_i32 = arith.constant 1 : i32
    %17 = arith.cmpi eq, %arg2, %c1_i32 : i32
    %18 = arith.extui %17 : i1 to i32
    %c0_i32_17 = arith.constant 0 : i32
    %19 = arith.cmpi ne, %18, %c0_i32_17 : i32
    scf.if %19 {
      %c0_18 = arith.constant 0 : index
      %c0_19 = arith.constant 0 : index
      %20 = vector.load %arg9[%c0_18, %c0_19] : memref<4x256xf32, #tpu.memory_space<vmem>>, vector<4x256xf32>
      %c0_20 = arith.constant 0 : index
      %c0_21 = arith.constant 0 : index
      %21 = vector.load %arg7[%c0_20, %c0_21] : memref<1x256xf32, #tpu.memory_space<vmem>>, vector<1x256xf32>
      %22 = vector.broadcast %21 : vector<1x256xf32> to vector<4x256xf32>
      %23 = arith.addf %20, %22 : vector<4x256xf32>
      %cst_22 = arith.constant 0.000000e+00 : f32
      %24 = vector.broadcast %cst_22 : f32 to vector<4x256xf32>
      %25 = arith.maximumf %23, %24 : vector<4x256xf32>
      %c0_23 = arith.constant 0 : index
      %c0_24 = arith.constant 0 : index
      %26 = vector.load %arg8[%c0_23, %c0_24] : memref<4x256xf32, #tpu.memory_space<vmem>>, vector<4x256xf32>
      tpu.vector_store %arg8[%c0_23, %c0_24], %25 {strides = array<i32>} : memref<4x256xf32, #tpu.memory_space<vmem>>, vector<4x256xf32>,
    } else {
    }
    return
  }
  func.func @transform_0(%arg0: i32, %arg1: i32, %arg2: i32) -> (i32, i32) {
    %c0_i32 = arith.constant 0 : i32
    return %arg0, %arg2 : i32, i32
  }
  func.func @transform_1(%arg0: i32, %arg1: i32, %arg2: i32) -> (i32, i32) {
    %c0_i32 = arith.constant 0 : i32
    return %arg0, %arg2 : i32, i32
  }
  func.func @transform_2(%arg0: i32, %arg1: i32, %arg2: i32) -> (i32, i32) {
    %c0_i32 = arith.constant 0 : i32
    return %arg2, %arg1 : i32, i32
  }
  func.func @transform_3(%arg0: i32, %arg1: i32, %arg2: i32) -> (i32, i32) {
    %c4_i32 = arith.constant 4 : i32
    %0 = arith.addi %c4_i32, %arg2 : i32
    %c0_i32 = arith.constant 0 : i32
    return %0, %arg1 : i32, i32
  }
  func.func @transform_4(%arg0: i32, %arg1: i32, %arg2: i32) -> (i32, i32) {
    %c0_i32 = arith.constant 0 : i32
    %c0_i32_0 = arith.constant 0 : i32
    return %c0_i32, %arg1 : i32, i32
  }
  func.func @transform_5(%arg0: i32, %arg1: i32, %arg2: i32) -> (i32, i32) {
    %c0_i32 = arith.constant 0 : i32
    return %arg0, %arg1 : i32, i32
  }
}

</mosaic_0001>

<bundles_post_ra>
// kernel: attention_substitute_decoder_ca.1
= control target key start
LH: loop header
LB: loop body
LE: loop exit
PB: predicated region body
PF: predicated region fallthrough
CT: control target
= control target key end

     0   :  { %s2179_s0 = inlined_call_operand.vmem [shape: f32[4,512], index: 0, kind: input, shape index: {}]   ;;  %s2180_s1 = inlined_call_operand.vmem [shape: f32[4,512], index: 1, kind: input, shape index: {}]   ;;  %s2181_s2 = inlined_call_operand.hbm [shape: bf16[2048,1024], index: 2, kind: input, shape index: {}, may-alias: {2,3}]   ;;  %s2182_s3 = inlined_call_operand.hbm [shape: bf16[2048,1024], index: 3, kind: input, shape index: {}, may-alias: {2,3}]   ;;  %s2183_s4 = inlined_call_operand.hbm [shape: f32[1,1024], index: 4, kind: input, shape index: {}]   ;;  %s2184_s5 = inlined_call_operand.vmem [shape: f32[4,512], index: 5, kind: output, shape index: {}]  }
   0x1   :  { %2199 = sst [smem:[#allocation16_spill]] %s2179_s0 }
   0x2   :  { %2200 = sst [smem:[#allocation17_spill]] %s2180_s1 }
   0x3   :  { %2201 = sst [smem:[#allocation18_spill]] %s2181_s2 }
   0x4   :  { %2202 = sst [smem:[#allocation19_spill]] %s2182_s3 }
   0x5   :  { %2203 = sst [smem:[#allocation20_spill]] %s2183_s4 }
   0x6   :  { %2204 = sst [smem:[#allocation21_spill]] %s2184_s5 }
   0x7   :  { %10 = vsyncpa [#allocation4], 0 }
   0x8   :  { %12 = vsyncpa [#allocation4 + $0x1], 0 }
   0x9   :  { %13 = vsyncpa [#allocation6], 0 }
   0xa   :  { %15 = vsyncpa [#allocation6 + $0x1], 0  ;;  %s1721_s18 = smov 0   ;;  %s1723_s19 = smov 0  }
   0xb   :  { %s1725_s20 = smov 0   ;;  %s1727_s21 = smov 0  }
   0xc   :  { %s1729_s22 = smov 0   ;;  %s1731_s23 = smov 0  }
   0xd   :  { %s1733_s24 = smov 0   ;;  %s1735_s25 = smov 0  }
   0xe   :  { %s1737_s26 = smov 0   ;;  %s1739_s27 = smov 0  }
   0xf   :  { %s1741_s28 = smov 0   ;;  %s1743_s29 = smov 0  }
  0x10   :  { %s1745_s30 = smov 0   ;;  %s1747_s6 = smov 0  }
  0x11 LB: > { %2205 = sst [smem:[#allocation11_spill]] %s1666_s27  ;;  %s33_s7 = sadd.s32 1, %s1674_s29  ;;  %s1682_s6 = sphi %s1747_s6, %s21_s6   ;;  %s1678_s30 = sphi %s1745_s30, %s2246_s30   ;;  %s1674_s29 = sphi %s1743_s29, %s2257_s29   ;;  %s1670_s28 = sphi %s1741_s28, %s2244_s28   ;;  %s1666_s27 = sphi %s1739_s27, %s2256_s27   ;;  %s1662_s26 = sphi %s1737_s26, %s2255_s26   ;;  %s1658_s25 = sphi %s1735_s25, %s2254_s25   ;;  %s1654_s24 = sphi %s1733_s24, %s2253_s24   ;;  %s1650_s23 = sphi %s1731_s23, %s2252_s23   ;;  %s1646_s22 = sphi %s1729_s22, %s2251_s22   ;;  %s1642_s21 = sphi %s1727_s21, %s2250_s21   ;;  %s1638_s20 = sphi %s1725_s20, %s2249_s20   ;;  %s1634_s19 = sphi %s1723_s19, %s2248_s19   ;;  %s1630_s18 = sphi %s1721_s18, %s2247_s18  }
  0x12   : > { %2206 = sst [smem:[#allocation12_spill]] %s1670_s28  ;;  %s36_s8 = sadd.s32 1, %s1678_s30 }
  0x13   : > { %2207 = sst [smem:[#allocation13_spill]] %s1678_s30  ;;  %p34_p0 = scmp.ge.s32.totalorder %s33_s7, 2 }
  0x14   : > { %p2190_p1 = scmp.eq.s32.totalorder %s1682_s6, 0  ;;  %s128_s9 = sadd.s32 4, %s1674_s29 }
  0x15   : > { %s135_s10 = sadd.s32 1, %s1650_s23  ;;  %s2259_s7 = smov (%p34_p0, %s33_s7), 0 }
  0x16   : > { %2208 = sst [smem:[#allocation14_spill]] %s2259_s7  ;;  %s2261_s8 = smov (!%p34_p0, %s36_s8), %s1678_s30 }
  0x17   : > { %s100_s11 = ssub.s32 %s1674_s29, %s2259_s7  ;;  %s129_s12 = sadd.s32 4, %s2259_s7 }
  0x18   : > { %p38_p2 = scmp.ge.s32.totalorder %s2261_s8, 2  ;;  %s130_s13 = ssub.s32 %s128_s9, %s129_s12 }
  0x19   : > { %p142_p3 = scmp.ne.s32.totalorder %s1650_s23, %s1646_s22  ;;  %p2189_p6 = scmp.lt.s32.totalorder %s1682_s6, 4 }
  0x1a   : > { %s2263_s8 = smov (%p38_p2, %s2261_s8), 0  ;;  %s1148_s9 = sshll.u32 %s1678_s30, 1 }
  0x1b   : > { %2209 = sst [smem:[#allocation15_spill]] %s2263_s8  ;;  %p1810_p5 = por %p142_p3, %p2190_p1 }
  0x1c   : > { %s1816_s15 = ssub.s32 %s1678_s30, %s2263_s8  ;;  %s1236_s12 = sshll.u32 %s1674_s29, 8 }
  0x1d   : > { %s1820_s16 = sor.u32 %s1816_s15, %s100_s11  ;;  %s132_s17 = sor.u32 %s130_s13, %s1816_s15 }
  0x1e   : > { %p133_p8 = scmp.eq.s32.totalorder %s132_s17, 0  ;;  %s1829_s5 = sadd.s32 %s1236_s12, %s1148_s9 }
  0x1f   : > { %s1150_s8 = sshll.u32 %s1829_s5, 6  ;;  %s276_s1 = sand.u32 1, %s1682_s6  }
  0x20   : > { %s1827_s7 = scalar_select %p133_p8, %s1650_s23, %s135_s10  }
  0x21   : > { %s278_s11 = sand.u32 1, %s1650_s23   ;;  %s2211_s3 = sld [smem:[#allocation19_spill]] }
  0x22   : > { %s1151_s0 = sshll.u32 %s278_s11, 8  ;;  %p1845_p9 = pnand %p2189_p6, %p1810_p5 }
  0x23   : > { %s280_s17 = scalar_lea.vmem [#allocation5], %s1151_s0  ;;  %p318_p11 = scmp.lt.s32.totalorder %s1682_s6, 5 }
  0x24   : > { %s291_s10 = sshll.u32 %s280_s17, 4  ;;  %s1853_s27 = scalar_lea.sflag [#allocation6], %s276_s1  ;;  %s1849_s10 = int_to_ptr.vmem [resolvable:$true] %s291_s10 }
  0x25   : > { %p1471_p13 = pneg %p1845_p9 }
  0x27   : > { %s1017_s13 = scalar_lea.hbm %s2211_s3, %s1150_s8  ;;  %s1474_s12 = scalar_lea.hbm %s2211_s3, 131072 }
  0x28   : > { %s1839_s4 = scalar_lea.hbm %s1017_s13, 65536  ;;  %s1499_s28 = scalar_lea.hbm %s1017_s13, 69632 }
  0x29   : > { %p1470_p12 = scmp.ne.s32.totalorder %s1839_s4, %s1499_s28  ;;  %p1475_p3 = scmp.lt.u32.totalorder %s1839_s4, %s2211_s3 }
  0x2a   : > { %p1476_p5 = scmp.lt.u32.totalorder %s1474_s12, %s1499_s28  ;;  %p1478_p4 = scmp.lt.u32.totalorder %s1499_s28, %s1839_s4 }
  0x2b   : > { %p1472_p0 = pnand %p1471_p13, %p1470_p12 }
  0x2c   : > { %p1477_p8 = por %p1476_p5, %p1475_p3 }
  0x2d   : > { %p1473_p2 = pneg %p1472_p0 }
  0x2e   : > { %p1479_p6 = por %p1478_p4, %p1477_p8 }
  0x30   : > { %p1480_p1 = pnand %p1479_p6, %p1473_p2 }
  0x32   : > { %1483 = shalt.err (!%p1480_p1)
}
  0x33   : > { %s1484_s1 = scalar_lea.vmem %s1849_s10, 4096  ;;  %s1684_s13 = smov [#allocation5]  }
  0x34   : > { %p1485_p12 = scmp.ne.s32.totalorder %s1849_s10, %s1484_s1  ;;  %s1489_s0 = sshll.u32 %s1684_s13, 4  ;;  %s1490_s0 = int_to_ptr.vmem [resolvable:$false] %s1489_s0 }
  0x35   : > { %s1491_s14 = scalar_lea.vmem %s1490_s0, 8192  ;;  %p1492_p10 = scmp.lt.s32.totalorder %s1849_s10, %s1490_s0 }
  0x36   : > { %p1487_p0 = pnand %p1485_p12, %p1471_p13  ;;  %p1493_p3 = scmp.lt.s32.totalorder %s1491_s14, %s1484_s1 }
  0x38   : > { %p1488_p7 = pneg %p1487_p0  ;;  %p1494_p5 = por %p1493_p3, %p1492_p10 }
  0x3a   : > { %p1495_p4 = pnand %p1494_p5, %p1488_p7 }
  0x3c   : > { %1498 = shalt.err (!%p1495_p4)
}
  0x3d   : > { %s2191_s28 = smov 512   ;;  %s2192_s12 = smov 128  }
  0x3e   : > { %s2193_s11 = smov 8   ;;  %p2213_p1 = scmp.ge.s32.totalorder %s1682_s6, 1 }
  0x3f   : > { %1250 = dma.hbm_to_vmem [thread:$0]  (!%p1845_p9), %s1839_s4, 4096, %s1849_s10, %s1853_s27, %s2191_s28, %s2192_s12, %s2193_s11  }
  0x40   : > { %p1887_p6 = pnand %p2213_p1, %p318_p11  ;;  %s105_s1 = sadd.s32 1, %s1662_s26 }
  0x41   : > { %p2215_p7 = scmp.eq.s32.totalorder %s1820_s16, 0  ;;  %p112_p10 = scmp.ne.s32.totalorder %s1662_s26, %s1658_s25 }
  0x42   : > { %s2214_s17 = scalar_select %p1887_p6, 1, 0 }
  0x43   : > { %s1895_s13 = scalar_select %p2215_p7, %s1662_s26, %s105_s1  }
  0x44   : > { %s252_s0 = sand.u32 1, %s1662_s26   ;;  %s2216_s2 = sld [smem:[#allocation18_spill]] }
  0x45   : > { %p2217_p9 = scmp.eq.s32.totalorder %s1682_s6, 0  ;;  %s1146_s4 = sshll.u32 %s252_s0, 8 }
  0x46   : > { %p2218_p2 = scmp.lt.s32.totalorder %s1682_s6, 4  ;;  %s256_s5 = scalar_lea.vmem [#allocation3], %s1146_s4 }
  0x47   : > { %p114_p11 = por %p2217_p9, %p112_p10  ;;  %s266_s10 = sshll.u32 %s256_s5, 4  ;;  %s1917_s10 = int_to_ptr.vmem [resolvable:$true] %s266_s10 }
  0x49   : > { %p1913_p8 = pnand %p2218_p2, %p114_p11 }
  0x4a   : > { %s1907_s3 = scalar_lea.hbm %s2216_s2, %s1150_s8  ;;  %s1919_s8 = scalar_lea.sflag [#allocation4], %s252_s0 }
  0x4b   : > { %s1500_s1 = scalar_lea.hbm %s1907_s3, 4096  ;;  %p1502_p0 = pneg %p1913_p8 }
  0x4c   : > { %p1501_p12 = scmp.ne.s32.totalorder %s1907_s3, %s1500_s1  ;;  %s1505_s28 = scalar_lea.hbm %s2216_s2, 131072 }
  0x4d   : > { %p1506_p4 = scmp.lt.u32.totalorder %s1907_s3, %s2216_s2  ;;  %p1507_p1 = scmp.lt.u32.totalorder %s1505_s28, %s1500_s1 }
  0x4e   : > { %p1503_p3 = pnand %p1502_p0, %p1501_p12  ;;  %p1509_p10 = scmp.lt.u32.totalorder %s1500_s1, %s1907_s3 }
  0x4f   : > { %p1508_p7 = por %p1507_p1, %p1506_p4 }
  0x50   : > { %p1504_p5 = pneg %p1503_p3 }
  0x51   : > { %p1510_p9 = por %p1509_p10, %p1508_p7 }
  0x53   : > { %p1511_p11 = pnand %p1510_p9, %p1504_p5 }
  0x55   : > { %1514 = shalt.err (!%p1511_p11)
}
  0x56   : > { %s1515_s0 = scalar_lea.vmem %s1917_s10, 4096  ;;  %s1688_s4 = smov [#allocation3]  }
  0x57   : > { %p1516_p2 = scmp.ne.s32.totalorder %s1917_s10, %s1515_s0  ;;  %s1520_s5 = sshll.u32 %s1688_s4, 4  ;;  %s1521_s5 = int_to_ptr.vmem [resolvable:$false] %s1520_s5 }
  0x58   : > { %s1522_s12 = scalar_lea.vmem %s1521_s5, 8192  ;;  %p1523_p13 = scmp.lt.s32.totalorder %s1917_s10, %s1521_s5 }
  0x59   : > { %p1518_p12 = pnand %p1516_p2, %p1502_p0  ;;  %p1524_p4 = scmp.lt.s32.totalorder %s1522_s12, %s1515_s0 }
  0x5b   : > { %p1519_p3 = pneg %p1518_p12  ;;  %p1525_p1 = por %p1524_p4, %p1523_p13 }
  0x5d   : > { %p1526_p7 = pnand %p1525_p1, %p1519_p3 }
  0x5f   : > { %1529 = shalt.err (!%p1526_p7)
}
  0x60   : > { %s2220_s28 = smov 8   ;;  %s2221_s11 = smov 128  }
  0x61   : > { %s2222_s1 = smov 512   ;;  %s1142_s16 = sadd.s32 4294967295, %s1682_s6  }
  0x62   : > { %1247 = dma.hbm_to_vmem [thread:$0]  (!%p1913_p8), %s1907_s3, 4096, %s1917_s10, %s1919_s8, %s2222_s1, %s2221_s11, %s2220_s28  }
  0x63   : > { %p159_p13 = scmp.eq.s32.totalorder %s1816_s15, 0  ;;  %p119_p0 = scmp.eq.s32.totalorder %s1142_s16, 0 }
  0x64   : > { %s161_s14 = sadd.s32 1, %s1638_s20  ;;  %p2223_p5 = scmp.ne.s32.totalorder %s1658_s25, %s1654_s24 }
  0x65   : > { %s1956_s9 = scalar_select %p159_p13, %s1638_s20, %s161_s14  }
  0x66   : > { %p1961_p10 = por %p119_p0, %p2223_p5  ;;  %p2225_p9 = scmp.ne.s32.totalorder %s1646_s22, %s1642_s21 }
  0x67   : > { %p168_p2 = scmp.ne.s32.totalorder %s1638_s20, %s1634_s19  ;;  %p174_p8 = scmp.ne.s32.totalorder %s1634_s19, %s1630_s18 }
  0x68   : > { %s2224_s0 = scalar_select %p1961_p10, 1, 0 }
  0x69   : > { %p1968_p11 = por %p2225_p9, %p119_p0  ;;  %s303_s3 = sand.u32 1, %s1638_s20  }
  0x6a   : > { %s1237_s10 = sshll.u32 %s1678_s30, 5  ;;  %p2227_p12 = scmp.eq.s32.totalorder %s1682_s6, 0 }
  0x6b   : > { %s2226_s4 = scalar_select %p1968_p11, 1, 0 }
  0x6c   : > { %p170_p3 = por %p168_p2, %p2227_p12  ;;  %p1980_p4 = por %p174_p8, %p119_p0 }
  0x6d   : > { %s1155_s24 = sshll.u32 %s303_s3, 1  ;;  %s2229_s12 = sld [smem:[#allocation20_spill]] }
  0x6e   : > { %s2228_s15 = scalar_select %p1980_p4, 1, 0 }
  0x6f   : > { %p2230_p1 = scmp.lt.s32.totalorder %s1682_s6, 4  ;;  %s305_s21 = scalar_lea.vmem [#allocation7], %s1155_s24 }
  0x70   : > { %s313_s11 = sshll.u32 %s305_s21, 4  ;;  %s314_s11 = int_to_ptr.vmem [resolvable:$true] %s313_s11 }
  0x71   : > { %p1991_p7 = pnand %p2230_p1, %p170_p3 }
  0x73   : > { %s1987_s28 = scalar_lea.hbm %s2229_s12, %s1237_s10  ;;  %p1532_p0 = pneg %p1991_p7 }
  0x74   : > { %s1530_s1 = scalar_lea.hbm %s1987_s28, 32  ;;  %s1535_s10 = scalar_lea.hbm %s2229_s12, 128 }
  0x75   : > { %p1531_p13 = scmp.ne.s32.totalorder %s1987_s28, %s1530_s1  ;;  %p1536_p2 = scmp.lt.u32.totalorder %s1987_s28, %s2229_s12 }
  0x76   : > { %p1537_p8 = scmp.lt.u32.totalorder %s1535_s10, %s1530_s1  ;;  %p1539_p3 = scmp.lt.u32.totalorder %s1530_s1, %s1987_s28 }
  0x77   : > { %p1533_p5 = pnand %p1532_p0, %p1531_p13 }
  0x78   : > { %p1538_p12 = por %p1537_p8, %p1536_p2 }
  0x79   : > { %p1534_p9 = pneg %p1533_p5 }
  0x7a   : > { %p1540_p1 = por %p1539_p3, %p1538_p12 }
  0x7c   : > { %p1541_p4 = pnand %p1540_p1, %p1534_p9 }
  0x7e   : > { %1544 = shalt.err (!%p1541_p4)
}
  0x7f   : > { %s1545_s24 = scalar_lea.vmem %s314_s11, 32  ;;  %s1689_s21 = smov [#allocation7]  }
  0x80   : > { %p1546_p11 = scmp.ne.s32.totalorder %s314_s11, %s1545_s24  ;;  %s1550_s14 = sshll.u32 %s1689_s21, 4  ;;  %s1551_s14 = int_to_ptr.vmem [resolvable:$false] %s1550_s14 }
  0x81   : > { %s1552_s3 = scalar_lea.vmem %s1551_s14, 64  ;;  %p1553_p10 = scmp.lt.s32.totalorder %s314_s11, %s1551_s14 }
  0x82   : > { %p1548_p13 = pnand %p1546_p11, %p1532_p0  ;;  %p1554_p6 = scmp.lt.s32.totalorder %s1552_s3, %s1545_s24 }
  0x84   : > { %p1549_p5 = pneg %p1548_p13  ;;  %p1555_p2 = por %p1554_p6, %p1553_p10 }
  0x86   : > { %p1556_p8 = pnand %p1555_p2, %p1549_p5 }
  0x88   : > { %1559 = shalt.err (!%p1556_p8)
}
  0x89   : > { %1253 = dma.hbm_to_vmem [thread:$0]  (!%p1991_p7), %s1987_s28, 32, %s314_s11, %s1853_s27  }
  0x8a   : > { %p2232_p4 = scmp.ne.s32.totalorder %s2214_s17, 0 }
  0x8b   : > { %s324_s1 = sand.u32 (!%p2232_p4), 1, %s1658_s25   ;;  %p2233_p11 = scmp.ne.s32.totalorder (!%p2232_p4), %s2224_s0, 0 }
  0x8c   : > { %322 = sbr.rel (%p2232_p4) target bundleno = 472 (0x1d8), region = 40  ;;  %s1159_s10 = sshll.u32 (!%p2232_p4), %s324_s1, 8 }
  0x8d   : > { %s325_s8 = scalar_lea.sflag (!%p2232_p4), [#allocation4], %s324_s1  ;;  %s2020_s5 = scalar_lea.vmem (!%p2232_p4), [#allocation3], %s1159_s10 }
  0x93   : > { %1617 = dma.done.wait (%p2233_p11), %s325_s8, 4096  }
  0x94   : > { %1619 = vsyncadd (%p2233_p11), %s325_s8, 4294963200  ;;  %s333_s27 = sand.u32 1, %s1142_s16   ;;  %s335_s28 = sand.u32 1, %s1646_s22  }
  0x95   : > { %s1160_s17 = sshll.u32 %s335_s28, 8  ;;  %s334_s18 = scalar_lea.sflag [#allocation6], %s333_s27 }
  0x96   : > { %s2029_s11 = scalar_lea.vmem [#allocation5], %s1160_s17  ;;  %p2234_p6 = scmp.ne.s32.totalorder %s2226_s4, 0 }
  0x98   : > { %1621 = dma.done.wait (%p2234_p6), %s334_s18, 4096  }
  0x99   : > { %1623 = vsyncadd (%p2234_p6), %s334_s18, 4294963200  ;;  %s344_s24 = sand.u32 1, %s1634_s19   ;;  %p2235_p10 = scmp.ne.s32.totalorder %s2228_s15, 0 }
  0x9a   : > { %s2036_s0 = sshll.u32 %s344_s24, 1 }
  0x9b   : > { %1625 = dma.done.wait (%p2235_p10), %s334_s18, 32  }
  0x9c   : > { %1627 = vsyncadd (%p2235_p10), %s334_s18, 4294967264  ;;  %s2236_s16 = sld [smem:[#allocation11_spill]]  ;;  %s2237_s14 = sld [smem:[#allocation12_spill]] }
  0x9d   : > { %s2238_s27 = sld [smem:[#allocation16_spill]]  ;;  %s2239_s21 = sld [smem:[#allocation17_spill]] }
  0x9e   : > { %s2240_s30 = sld [smem:[#allocation21_spill]] }
  0xa2   : > { %s1162_s3 = sshll.u32 %s2236_s16, 1  ;;  %s1166_s1 = sshll.u32 %s2237_s14, 1 }
  0xa3   : > { %p408_p7 = scmp.lt.s32.totalorder %s1162_s3, 3  ;;  %p434_p0 = scmp.lt.s32.totalorder %s1166_s1, 3 }
  0xa4   : > { %p1168_p9 = scmp.ne.s32.totalorder %s2236_s16, 0 }
  0xa5   : > { %s2265_s3 = smov (!%p408_p7, %s1162_s3), 3  ;;  %s2267_s1 = smov (!%p434_p0, %s1166_s1), 3 }
  0xa6   : > { %s1163_s4 = sshll.u32 %s2265_s3, 2  ;;  %s1167_s15 = sshll.u32 %s2267_s1, 2  ;;  %v1690_v0 = vmov (!%p1168_p9), 0.0  }
  0xa7   : > { %s2048_s28 = scalar_lea.vmem %s2238_s27, %s1163_s4  ;;  %s2053_s2 = scalar_lea.vmem %s2239_s21, %s1163_s4  ;;  %445 = vst [vmem:[#allocation2] sm:$0xff] (!%p1168_p9), %v1690_v0 }
  0xa8   : > { %s2058_s14 = scalar_lea.vmem %s2240_s30, %s1167_s15  ;;  %444 = sbr.rel (%p1168_p9) target bundleno = 175 (0xaf), region = 56 }
  0xaf PF: > { %v1371_v1 = vld [vmem:[%s2020_s5 + $0x4] ss:$8 sps:$4 sm:$0xff]   ;;  %v1373_v2 = vld [vmem:[%s2020_s5] ss:$8 sps:$4 sm:$0xff]   ;;  %v1374_v3 = vld [vmem:[%s2020_s5 + $0x14] ss:$8 sps:$4 sm:$0xff]  }
  0xb0   : > { %651 = vmatprep.subr.bf16.mxu0 %v1371_v1  ;;  %v1376_v4 = vld [vmem:[%s2020_s5 + $0x10] ss:$8 sps:$4 sm:$0xff]   ;;  %v1377_v5 = vld [vmem:[%s2029_s11 + $0x4] ss:$8 sps:$4 sm:$0xff]   ;;  %v1381_v7 = vld [vmem:[%s2029_s11] ss:$8 sps:$4 sm:$0xff]  }
  0xb1   : > { %652 = vmatpush1.bf16.msra.mxu0 %v1373_v2  ;;  %v1379_v6 = vld [vmem:[%s2020_s5 + $0x24] ss:$8 sps:$4 sm:$0xff]   ;;  %891 = vmatprep.subr.bf16.mxu1 %v1377_v5  ;;  %v1383_v8 = vld [vmem:[%s2029_s11 + $0x14] ss:$8 sps:$4 sm:$0xff]   ;;  %v1382_v9 = vld [vmem:[%s2020_s5 + $0x20] ss:$8 sps:$4 sm:$0xff]  }
  0xb2   : > { %653 = vmatprep.subr.bf16.mxu0 %v1374_v3  ;;  %892 = vmatpush1.bf16.msra.mxu1 %v1381_v7  ;;  %v1385_v10 = vld [vmem:[%s2020_s5 + $0x34] ss:$8 sps:$4 sm:$0xff]   ;;  %v1387_v11 = vld [vmem:[%s2029_s11 + $0x10] ss:$8 sps:$4 sm:$0xff]   ;;  %v1389_v12 = vld [vmem:[%s2029_s11 + $0x24] ss:$8 sps:$4 sm:$0xff]  }
  0xb3   : > { %893 = vmatprep.subr.bf16.mxu1 %v1383_v8  ;;  %v1388_v13 = vld [vmem:[%s2020_s5 + $0x30] ss:$8 sps:$4 sm:$0xff]   ;;  %v1393_v14 = vld [vmem:[%s2029_s11 + $0x20] ss:$8 sps:$4 sm:$0xff]   ;;  %v1395_v15 = vld [vmem:[%s2029_s11 + $0x34] ss:$8 sps:$4 sm:$0xff]  }
  0xb4   : > { %v1391_v16 = vld [vmem:[%s2020_s5 + $0x44] ss:$8 sps:$4 sm:$0xff]   ;;  %v1399_v17 = vld [vmem:[%s2029_s11 + $0x30] ss:$8 sps:$4 sm:$0xff]   ;;  %v1394_v18 = vld [vmem:[%s2020_s5 + $0x40] ss:$8 sps:$4 sm:$0xff]  }
  0xb5   : > { %654 = vmatpush1.bf16.msra.mxu0 %v1376_v4  ;;  %v1401_v19 = vld [vmem:[%s2029_s11 + $0x44] ss:$8 sps:$4 sm:$0xff]   ;;  %v1397_v20 = vld [vmem:[%s2020_s5 + $0x54] ss:$8 sps:$4 sm:$0xff]   ;;  %v1400_v21 = vld [vmem:[%s2020_s5 + $0x50] ss:$8 sps:$4 sm:$0xff]  }
  0xb6   : > { %655 = vmatprep.subr.bf16.mxu0 %v1379_v6  ;;  %894 = vmatpush1.bf16.msra.mxu1 %v1387_v11  ;;  %v1405_v22 = vld [vmem:[%s2029_s11 + $0x40] ss:$8 sps:$4 sm:$0xff]   ;;  %v1407_v23 = vld [vmem:[%s2029_s11 + $0x54] ss:$8 sps:$4 sm:$0xff]   ;;  %v1403_v24 = vld [vmem:[%s2020_s5 + $0x64] ss:$8 sps:$4 sm:$0xff]  }
  0xb7   : > { %895 = vmatprep.subr.bf16.mxu1 %v1389_v12  ;;  %v1411_v25 = vld [vmem:[%s2029_s11 + $0x50] ss:$8 sps:$4 sm:$0xff]   ;;  %v1406_v26 = vld [vmem:[%s2020_s5 + $0x60] ss:$8 sps:$4 sm:$0xff]   ;;  %v1413_v27 = vld [vmem:[%s2029_s11 + $0x64] ss:$8 sps:$4 sm:$0xff]  }
  0xb8   : > { %v1409_v28 = vld [vmem:[%s2020_s5 + $0x74] ss:$8 sps:$4 sm:$0xff]   ;;  %v1412_v29 = vld [vmem:[%s2020_s5 + $0x70] ss:$8 sps:$4 sm:$0xff]   ;;  %v1417_v30 = vld [vmem:[%s2029_s11 + $0x60] ss:$8 sps:$4 sm:$0xff]  }
  0xb9   : > { %656 = vmatpush1.bf16.msra.mxu0 %v1382_v9  ;;  %v1419_v31 = vld [vmem:[%s2029_s11 + $0x74] ss:$8 sps:$4 sm:$0xff]   ;;  %v1415_v32 = vld [vmem:[%s2020_s5 + $0x84] ss:$8 sps:$4 sm:$0xff]   ;;  %v1423_v33 = vld [vmem:[%s2029_s11 + $0x70] ss:$8 sps:$4 sm:$0xff]  }
  0xba   : > { %657 = vmatprep.subr.bf16.mxu0 %v1385_v10  ;;  %896 = vmatpush1.bf16.msra.mxu1 %v1393_v14  ;;  %v1418_v34 = vld [vmem:[%s2020_s5 + $0x80] ss:$8 sps:$4 sm:$0xff]   ;;  %v1425_v35 = vld [vmem:[%s2029_s11 + $0x84] ss:$8 sps:$4 sm:$0xff]   ;;  %v1421_v36 = vld [vmem:[%s2020_s5 + $0x94] ss:$8 sps:$4 sm:$0xff]  }
  0xbb   : > { %897 = vmatprep.subr.bf16.mxu1 %v1395_v15  ;;  %v1424_v37 = vld [vmem:[%s2020_s5 + $0x90] ss:$8 sps:$4 sm:$0xff]   ;;  %v1429_v38 = vld [vmem:[%s2029_s11 + $0x80] ss:$8 sps:$4 sm:$0xff]   ;;  %v1431_v39 = vld [vmem:[%s2029_s11 + $0x94] ss:$8 sps:$4 sm:$0xff]  }
  0xbc   : > { %v1427_v40 = vld [vmem:[%s2020_s5 + $0xa4] ss:$8 sps:$4 sm:$0xff]   ;;  %v1435_v41 = vld [vmem:[%s2029_s11 + $0x90] ss:$8 sps:$4 sm:$0xff]   ;;  %v1430_v42 = vld [vmem:[%s2020_s5 + $0xa0] ss:$8 sps:$4 sm:$0xff]  }
  0xbd   : > { %658 = vmatpush1.bf16.msra.mxu0 %v1388_v13  ;;  %v1433_v43 = vld [vmem:[%s2020_s5 + $0xb4] ss:$8 sps:$4 sm:$0xff]   ;;  %v1437_v44 = vld [vmem:[%s2029_s11 + $0xa4] ss:$8 sps:$4 sm:$0xff]   ;;  %v1441_v47 = vld [vmem:[%s2029_s11 + $0xa0] ss:$8 sps:$4 sm:$0xff]  }
  0xbe   : > { %659 = vmatprep.subr.bf16.mxu0 %v1391_v16  ;;  %898 = vmatpush1.bf16.msra.mxu1 %v1399_v17  ;;  %v446_v45 = vld [vmem:[%s2048_s28] sm:$0xff]  ;;  %v1439_v52 = vld [vmem:[%s2020_s5 + $0xc4] ss:$8 sps:$4 sm:$0xff]   ;;  %v1442_v56 = vld [vmem:[%s2020_s5 + $0xc0] ss:$8 sps:$4 sm:$0xff]  }
  0xbf   : > { %899 = vmatprep.subr.bf16.mxu1 %v1401_v19  ;;  %v448_v46 = vcombine.high %v446_v45, %v446_v45  ;;  %v1436_v48 = vld [vmem:[%s2020_s5 + $0xb0] ss:$8 sps:$4 sm:$0xff]   ;;  %v1443_v49 = vld [vmem:[%s2029_s11 + $0xb4] ss:$8 sps:$4 sm:$0xff]   ;;  %v1449_v57 = vld [vmem:[%s2029_s11 + $0xc4] ss:$8 sps:$4 sm:$0xff]   ;;  %v450_v6 = vpack.c.bf16 %v446_v45, %v446_v45 }
  0xc0   : > { %v452_v51 = vld [vmem:[%s2053_s2] sm:$0xff]  ;;  %v1453_v59 = vld [vmem:[%s2029_s11 + $0xc0] ss:$8 sps:$4 sm:$0xff]   ;;  %v1451_v62 = vld [vmem:[%s2020_s5 + $0xe4] ss:$8 sps:$4 sm:$0xff]   ;;  %s2241_s2 = sld [smem:[#allocation11_spill]] }
  0xc1   : > { %660 = vmatpush1.bf16.msra.mxu0 %v1394_v18  ;;  %v451_v50 = vpack.c.bf16 %v448_v46, %v448_v46  ;;  %v454_v53 = vcombine.high %v452_v51, %v452_v51  ;;  %v1447_v54 = vld [vmem:[%s2029_s11 + $0xb0] ss:$8 sps:$4 sm:$0xff]   ;;  %v1445_v58 = vld [vmem:[%s2020_s5 + $0xd4] ss:$8 sps:$4 sm:$0xff]   ;;  %v1454_v0 = vld [vmem:[%s2020_s5 + $0xe0] ss:$8 sps:$4 sm:$0xff]   ;;  %v456_v8 = vpack.c.bf16 %v452_v51, %v452_v51 }
  0xc2   : > { %661 = vmatprep.subr.bf16.mxu0 %v1397_v20  ;;  %900 = vmatpush1.bf16.msra.mxu1 %v1405_v22  ;;  %v1448_v60 = vld [vmem:[%s2020_s5 + $0xd0] ss:$8 sps:$4 sm:$0xff]   ;;  %v1455_v61 = vld [vmem:[%s2029_s11 + $0xd4] ss:$8 sps:$4 sm:$0xff]   ;;  %v1462_v1 = vld [vmem:[%s2029_s11 + $0xe4] ss:$8 sps:$4 sm:$0xff]  }
  0xc3   : > { %901 = vmatprep.subr.bf16.mxu1 %v1407_v23  ;;  %683 = vmatprep.mubr.bf16.mxu0 %v451_v50  ;;  %v457_v55 = vpack.c.bf16 %v454_v53, %v454_v53  ;;  %v1459_v63 = vld [vmem:[%s2029_s11 + $0xd0] ss:$8 sps:$4 sm:$0xff]   ;;  %v1457_v2 = vld [vmem:[%s2020_s5 + $0xf4] ss:$8 sps:$4 sm:$0xff]   ;;  %v1464_v3 = vld [vmem:[%s2029_s11 + $0xe0] ss:$8 sps:$4 sm:$0xff]  }
  0xc4   : > { %v1460_v4 = vld [vmem:[%s2020_s5 + $0xf0] ss:$8 sps:$4 sm:$0xff]   ;;  %v1465_v5 = vld [vmem:[%s2029_s11 + $0xf4] ss:$8 sps:$4 sm:$0xff]  }
  0xc5   : > { %662 = vmatpush1.bf16.msra.mxu0 %v1400_v21  ;;  %923 = vmatprep.mubr.bf16.mxu1 %v457_v55  ;;  %v1467_v7 = vld [vmem:[%s2029_s11 + $0xf0] ss:$8 sps:$4 sm:$0xff]  }
  0xc6   : > { %663 = vmatprep.subr.bf16.mxu0 %v1403_v24  ;;  %902 = vmatpush1.bf16.msra.mxu1 %v1411_v25  ;;  %v458_v10 = vld [vmem:[#allocation2] sm:$0xff]  ;;  %p1233_p12 = scmp.ne.s32.totalorder %s2241_s2, 1 }
  0xc7   : > { %903 = vmatprep.subr.bf16.mxu1 %v1413_v27  ;;  %v945_v22 = vlaneseq (!%p1233_p12)  ;;  %s2242_s30 = scalar_lea.vmem (!%p1233_p12), [#allocation7], %s2036_s0 }
  0xc8   : > { %v943_v24 = vld [vmem:[%s2242_s30] sm:$0x3] (!%p1233_p12) }
  0xc9   : > { %664 = vmatpush1.bf16.msra.mxu0 %v1406_v26  ;;  %v946_v23 = vshrl.u32 (!%p1233_p12), %v945_v22, 7 }
  0xca   : > { %665 = vmatprep.subr.bf16.mxu0 %v1409_v28  ;;  %904 = vmatpush1.bf16.msra.mxu1 %v1417_v30 }
  0xcb   : > { %905 = vmatprep.subr.bf16.mxu1 %v1419_v31  ;;  %v947_v25 = vsub.s32 (!%p1233_p12), 0, %v946_v23  ;;  %v951_v26 = vsub.s32 (!%p1233_p12), 1, %v946_v23 }
  0xcd   : > { %666 = vmatpush1.bf16.msra.mxu0 %v1412_v29  ;;  %v948_v27 = vrot.slane (!%p1233_p12), %v943_v24, %v947_v25  ;;  %v952_v28 = vrot.slane (!%p1233_p12), %v943_v24, %v951_v26 }
  0xce   : > { %667 = vmatprep.subr.bf16.mxu0 %v1415_v32  ;;  %906 = vmatpush1.bf16.msra.mxu1 %v1423_v33 }
  0xcf   : > { %907 = vmatprep.subr.bf16.mxu1 %v1425_v35  ;;  %v953_v30 = vcombine.low (!%p1233_p12), %v948_v27, %v952_v28 }
  0xd1   : > { %668 = vmatpush1.bf16.msra.mxu0 %v1418_v34 }
  0xd2   : > { %669 = vmatprep.subr.bf16.mxu0 %v1421_v36  ;;  %908 = vmatpush1.bf16.msra.mxu1 %v1429_v38 }
  0xd3   : > { %909 = vmatprep.subr.bf16.mxu1 %v1431_v39 }
  0xd5   : > { %670 = vmatpush1.bf16.msra.mxu0 %v1424_v37 }
  0xd6   : > { %671 = vmatprep.subr.bf16.mxu0 %v1427_v40  ;;  %910 = vmatpush1.bf16.msra.mxu1 %v1435_v41 }
  0xd7   : > { %911 = vmatprep.subr.bf16.mxu1 %v1437_v44 }
  0xd9   : > { %672 = vmatpush1.bf16.msra.mxu0 %v1430_v42 }
  0xda   : > { %673 = vmatprep.subr.bf16.mxu0 %v1433_v43  ;;  %912 = vmatpush1.bf16.msra.mxu1 %v1441_v47 }
  0xdb   : > { %913 = vmatprep.subr.bf16.mxu1 %v1443_v49 }
  0xdd   : > { %674 = vmatpush1.bf16.msra.mxu0 %v1436_v48 }
  0xde   : > { %675 = vmatprep.subr.bf16.mxu0 %v1439_v52  ;;  %914 = vmatpush1.bf16.msra.mxu1 %v1447_v54 }
  0xdf   : > { %915 = vmatprep.subr.bf16.mxu1 %v1449_v57 }
  0xe1   : > { %676 = vmatpush1.bf16.msra.mxu0 %v1442_v56 }
  0xe2   : > { %677 = vmatprep.subr.bf16.mxu0 %v1445_v58  ;;  %916 = vmatpush1.bf16.msra.mxu1 %v1453_v59 }
  0xe3   : > { %917 = vmatprep.subr.bf16.mxu1 %v1455_v61 }
  0xe5   : > { %678 = vmatpush1.bf16.msra.mxu0 %v1448_v60 }
  0xe6   : > { %679 = vmatprep.subr.bf16.mxu0 %v1451_v62  ;;  %918 = vmatpush1.bf16.msra.mxu1 %v1459_v63 }
  0xe7   : > { %919 = vmatprep.subr.bf16.mxu1 %v1462_v1 }
  0xe9   : > { %680 = vmatpush1.bf16.msra.mxu0 %v1454_v0 }
  0xea   : > { %681 = vmatprep.subr.bf16.mxu0 %v1457_v2  ;;  %920 = vmatpush1.bf16.msra.mxu1 %v1464_v3 }
  0xeb   : > { %921 = vmatprep.subr.bf16.mxu1 %v1465_v5 }
  0xed   : > { %682 = vmatpush1.bf16.msra.mxu0 %v1460_v4 }
  0xee   : > { %922 = vmatpush1.bf16.msra.mxu1 %v1467_v7 }
  0xf0   : > { %684 = vmatmul.mubr.bf16.vlgmr.msra.gmra.mrb[0].mxu0 %v450_v6 }
  0xf1   : > { %924 = vmatmul.mubr.bf16.vlgmr.msra.gmra.mrb[0].mxu1 %v456_v8 }
 0x1c3   : > { %v685_v9 = vpop.f32.mrb[0].mxu0 }
 0x1c4   : > { %v687_v11 = vpop.f32.mrb[1].mxu0  ;;  %v925_v15 = vpop.f32.mrb[0].mxu1 }
 0x1c5   : > { %v694_v12 = vcombine.low %v685_v9, %v687_v11  ;;  %v689_v13 = vpop.f32.mrb[2].mxu0  ;;  %v927_v17 = vpop.f32.mrb[1].mxu1  ;;  %941 = sbr.rel (%p1233_p12) target bundleno = 472 (0x1d8), region = 60 }
 0x1c6   : > { %v690_v14 = vpop.f32.mrb[3].mxu0  ;;  %v934_v18 = vcombine.low %v925_v15, %v927_v17  ;;  %v929_v19 = vpop.f32.mrb[2].mxu1 }
 0x1c7   : > { %v696_v16 = vadd.f32 %v694_v12, %v458_v10  ;;  %v930_v20 = vpop.f32.mrb[3].mxu1 }
 0x1c9   : > { %v936_v21 = vadd.f32 %v934_v18, %v696_v16 }
 0x1cb   : > { %937 = vst [vmem:[#allocation2] sm:$0xff] %v936_v21 }
 0x1d2   : > { %v942_v29 = vld [vmem:[#allocation2] sm:$0xff] }
 0x1d3   : > { %v955_v31 = vadd.f32 %v953_v30, %v942_v29 }
 0x1d5   : > { %v956_v32 = vmax.f32 %v955_v31, 0.0 }
 0x1d7   : > { %957 = vst [vmem:[%s2058_s14] sm:$0xff] %v956_v32 }
 0x1d8 PF: > { %s21_s6 = sadd.s32 1, %s1682_s6   ;;  %s2244_s28 = sld [smem:[#allocation13_spill]] }
 0x1d9   : > { %p2132_p3 = scmp.ge.s32.totalorder %s21_s6, 6   ;;  %s2245_s5 = sld [smem:[#allocation14_spill]] }
 0x1da   : > { %s2246_s30 = sld [smem:[#allocation15_spill]]  ;;  %s2247_s18 = smov %s1634_s19 }
 0x1db   : > { %s2248_s19 = smov %s1638_s20  ;;  %s2249_s20 = smov %s1956_s9 }
 0x1dc   : > { %s2250_s21 = smov %s1646_s22  ;;  %s2251_s22 = smov %s1650_s23 }
 0x1dd   : > { %s2252_s23 = smov %s1827_s7  ;;  %s2253_s24 = smov %s1658_s25 }
 0x1de   : > { %s2254_s25 = smov %s1662_s26  ;;  %s2255_s26 = smov %s1895_s13 }
 0x1df   : > { %s2256_s27 = smov %s1674_s29  ;;  %s2257_s29 = smov %s2245_s5 }
 0x1e0   :  { %20 = sbr.rel (!%p2132_p3) target bundleno = 17 (0x11), region = 118 }
 0x1e7   :  { %988 = vsyncpa [#allocation4], 1 }
 0x1e8   :  { %990 = vsyncpa [#allocation4 + $0x1], 1 }
 0x1e9   :  { %991 = vsyncpa [#allocation6], 1 }
 0x1ea   :  { %993 = vsyncpa [#allocation6 + $0x1], 1 }

</bundles_post_ra>
